<compile_context>
chip_gen: v5e
topology: v5e:2x2
jax: 0.10.0
libtpu: 0.0.40
codegen_flags: <defaults>
</compile_context>

<pallas_src>
import functools
import math

import numpy as np
import jax
import jax.numpy as jnp
from jax import lax
from jax.experimental import pallas as pl
from jax.experimental.pallas import tpu as pltpu


_PHOTO_TILE = 8192      # pixels per block for pointwise / stats kernels
_EQ_TILE = 2048         # pixels per block for equalize passes
_AFF_TN_CAP = 512       # output pixels per affine step
_AFF_TK_CAP = 256       # source  pixels per affine contraction step


# ---------------------------------------------------------------------------
# host-side glue
# ---------------------------------------------------------------------------
def _get_inverse_affine_matrix(center, angle, translate, scale, shear):
    rot = math.radians(angle)
    sx = math.radians(shear[0])
    sy = math.radians(shear[1])
    cx, cy = center
    tx, ty = translate
    a = math.cos(rot - sy) / math.cos(sy)
    b = -math.cos(rot - sy) * math.tan(sx) / math.cos(sy) - math.sin(rot)
    c = math.sin(rot - sy) / math.cos(sy)
    d = -math.sin(rot - sy) * math.tan(sx) / math.cos(sy) + math.cos(rot)
    matrix = [d, -b, 0.0, -c, a, 0.0]
    matrix = [x / scale for x in matrix]
    matrix[2] += matrix[0] * (-cx - tx) + matrix[1] * (-cy - ty)
    matrix[5] += matrix[3] * (-cx - tx) + matrix[4] * (-cy - ty)
    matrix[2] += cx
    matrix[5] += cy
    return matrix


def _divisor_tile(hwp, cap):
    """Largest multiple of 128 that divides hwp and is <= cap (hwp % 128 == 0)."""
    m = max(1, min(cap, hwp) // 128)
    while m > 1 and hwp % (m * 128) != 0:
        m -= 1
    return m * 128


def _pad_and_tile(hw, cap):
    """(padded hw, tile): single untiled block when hw <= cap, else pad to 128."""
    if hw <= cap:
        return hw, hw
    hwp = ((hw + 127) // 128) * 128
    return hwp, _divisor_tile(hwp, cap)


def _affine_tiling(hw):
    if hw <= _AFF_TK_CAP:
        return hw, hw, hw
    hwp = ((hw + 127) // 128) * 128
    return hwp, _divisor_tile(hwp, _AFF_TN_CAP), _divisor_tile(hwp, _AFF_TK_CAP)


def _affine_src_indices(H, W, matrix):
    """Flat nearest-neighbour source index per output pixel; -1 for OOB (zero fill)."""
    m0, m1, m2, m3, m4, m5 = matrix
    o = np.arange(H * W, dtype=np.int64)
    i = (o // W).astype(np.float64)
    j = (o % W).astype(np.float64)
    X = j - 0.5 * W + 0.5
    Y = i - 0.5 * H + 0.5
    src_x = m0 * X + m1 * Y + m2 + 0.5 * (W - 1)
    src_y = m3 * X + m4 * Y + m5 + 0.5 * (H - 1)
    xi = np.rint(src_x)      # half-to-even, same as grid_sample nearest
    yi = np.rint(src_y)
    inb = (xi >= 0) & (xi <= W - 1) & (yi >= 0) & (yi <= H - 1)
    src = (np.clip(yi, 0, H - 1).astype(np.int64) * W
           + np.clip(xi, 0, W - 1).astype(np.int64))
    return np.where(inb, src, -1).astype(np.int32)


# ---------------------------------------------------------------------------
# Kernel 1: affine warp, NEAREST, zero fill (ShearX/Y, TranslateX/Y, Rotate)
# ---------------------------------------------------------------------------
def _make_affine_kernel(TN, TK, KMAX, KB):
    def kernel(ks_ref, sp_ref, idx_ref, img_ref, out_ref, acc_ref):
        n = pl.program_id(0)
        k = pl.program_id(1)

        @pl.when(k == 0)
        def _():
            acc_ref[...] = jnp.zeros_like(acc_ref)

        kb = jnp.minimum(ks_ref[n] + k, KMAX - 1)

        @pl.when(k < sp_ref[n])
        def _():
            base = kb * TK
            s = lax.broadcasted_iota(jnp.int32, (TK, TN), 0) + base
            selT = (s == idx_ref[...]).astype(jnp.bfloat16)          # (TK, TN)
            acc_ref[...] += jnp.dot(img_ref[...], selT,
                                    preferred_element_type=jnp.float32)

        @pl.when(k == KB - 1)
        def _():
            out_ref[...] = acc_ref[...].astype(out_ref.dtype)

    return kernel


@functools.lru_cache(maxsize=None)
def _build_affine_call(C, HWp, TN, TK, KB):
    KMAX = HWp // TK
    NT = HWp // TN
    gs = pltpu.PrefetchScalarGridSpec(
        num_scalar_prefetch=2,
        grid=(NT, KB),
        in_specs=[
            pl.BlockSpec((1, TN), lambda n, k, ks, sp: (0, n)),
            pl.BlockSpec((C, TK),
                         lambda n, k, ks, sp: (0, jnp.minimum(ks[n] + k, KMAX - 1))),
        ],
        out_specs=pl.BlockSpec((C, TN), lambda n, k, ks, sp: (0, n)),
        scratch_shapes=[pltpu.VMEM((C, TN), jnp.float32)])
    fn = pl.pallas_call(
        _make_affine_kernel(TN, TK, KMAX, KB),
        out_shape=jax.ShapeDtypeStruct((C, HWp), jnp.bfloat16),
        grid_spec=gs,
        compiler_params=pltpu.CompilerParams(
            dimension_semantics=("parallel", "arbitrary")))
    return jax.jit(fn)


def affine_nearest_pallas(img, matrix):
    # TODO(synk): stack batch*channels into the matmul M dimension when a batch
    # of images is available (MXU is ~1-2% utilized with M=C=3).
    C, H, W = img.shape
    HW = H * W
    x = img.astype(jnp.bfloat16).reshape(C, HW)
    HWp, TN, TK = _affine_tiling(HW)
    NT, KMAX = HWp // TN, HWp // TK

    src = _affine_src_indices(H, W, matrix)
    srcp = np.full(HWp, -1, np.int32)
    srcp[:HW] = src

    seg = srcp.reshape(NT, TN)
    big = np.where(seg >= 0, seg, np.iinfo(np.int32).max)
    mn = big.min(axis=1)
    mx = seg.max(axis=1)
    has = mx >= 0
    klo = np.where(has, mn, 0) // TK
    khi = np.where(has, mx, 0) // TK
    ks = klo.astype(np.int32)
    sp = np.where(has, khi - klo + 1, 0).astype(np.int32)

    # bucket the band depth to a power of two so magnitudes share executables
    span_max = int(sp.max()) if NT > 0 else 1
    KB = 1
    while KB < max(1, span_max):
        KB *= 2
    KB = min(KB, KMAX)

    xp = jnp.pad(x, ((0, 0), (0, HWp - HW))) if HWp != HW else x
    out = _build_affine_call(C, HWp, TN, TK, KB)(
        jnp.asarray(ks), jnp.asarray(sp),
        jnp.asarray(srcp.reshape(1, HWp)), xp)
    return out[:, :HW].reshape(C, H, W)


# ---------------------------------------------------------------------------
# Kernel 2: fused photometric ops (pixel-tiled, op-id dispatch) + stats kernel
# ---------------------------------------------------------------------------
_PHOTO_IDS = {"Identity": 0, "Brightness": 1, "Color": 2, "Contrast": 3,
              "Posterize": 4, "Solarize": 5, "Invert": 6, "AutoContrast": 7}


def _make_stats_kernel(C, HW, HWp, TS):
    padded = HWp != HW

    def kernel(img_ref, st_ref):
        t = pl.program_id(0)

        @pl.when(t == 0)
        def _():
            col = lax.broadcasted_iota(jnp.int32, (C, 8), 1)
            st_ref[...] = jnp.where(col == 0, 300.0,
                                    jnp.where(col == 1, -1.0, 0.0))

        x = img_ref[...].astype(jnp.float32)                       # (C, TS)
        if padded:
            gidx = lax.broadcasted_iota(jnp.int32, (1, TS), 1) + t * TS
            valid = gidx < HW
            xmin = jnp.where(valid, x, 300.0)
            xmax = jnp.where(valid, x, -1.0)
        else:
            valid = None
            xmin, xmax = x, x
        mn = jnp.min(xmin, axis=1, keepdims=True)
        mx = jnp.max(xmax, axis=1, keepdims=True)
        if C >= 3:
            gray = jnp.floor(0.2989 * x[0:1] + 0.587 * x[1:2] + 0.114 * x[2:3])
        else:
            gray = x[0:1]
        if padded:
            gray = jnp.where(valid, gray, 0.0)
        gsum = jnp.sum(gray)
        st_ref[:, 0:1] = jnp.minimum(st_ref[:, 0:1], mn)
        st_ref[:, 1:2] = jnp.maximum(st_ref[:, 1:2], mx)
        st_ref[0:1, 2:3] = st_ref[0:1, 2:3] + gsum

    return kernel


@functools.lru_cache(maxsize=None)
def _build_photo_stats_call(C, H, W):
    HW = H * W
    HWp, TS = _pad_and_tile(HW, _PHOTO_TILE)
    NT = HWp // TS
    fn = pl.pallas_call(
        _make_stats_kernel(C, HW, HWp, TS),
        out_shape=jax.ShapeDtypeStruct((C, 8), jnp.float32),
        grid=(NT,),
        in_specs=[pl.BlockSpec((C, TS), lambda t: (0, t))],
        out_specs=pl.BlockSpec((C, 8), lambda t: (0, 0)),
        compiler_params=pltpu.CompilerParams(dimension_semantics=("arbitrary",)))
    return jax.jit(fn)


def _make_photometric_kernel(C, HW):
    def _blend(a, b, ratio):
        # torchvision _blend on uint8: clamp then truncate-cast
        return jnp.floor(jnp.clip(ratio * a + (1.0 - ratio) * b, 0.0, 255.0))

    def _gray(x):
        if C >= 3:
            return jnp.floor(0.2989 * x[0:1] + 0.587 * x[1:2] + 0.114 * x[2:3])
        return x[0:1]

    def kernel(op_ref, par_ref, st_ref, img_ref, out_ref):
        op = op_ref[0]
        p = par_ref[0]
        x = img_ref[...].astype(jnp.float32)                       # (C, TN)
        dt = out_ref.dtype

        @pl.when(op == _PHOTO_IDS["Identity"])
        def _():
            out_ref[...] = x.astype(dt)

        @pl.when(op == _PHOTO_IDS["Brightness"])                   # p = 1 + mag
        def _():
            out_ref[...] = _blend(x, 0.0, p).astype(dt)

        @pl.when(op == _PHOTO_IDS["Color"])                        # p = 1 + mag
        def _():
            out_ref[...] = _blend(x, _gray(x), p).astype(dt)

        @pl.when(op == _PHOTO_IDS["Contrast"])                     # p = 1 + mag
        def _():
            mean = st_ref[2] / float(HW)                           # global gray mean
            out_ref[...] = _blend(x, mean, p).astype(dt)

        @pl.when(op == _PHOTO_IDS["Posterize"])                    # p = 2**(8-bits)
        def _():
            out_ref[...] = (jnp.floor(x / p) * p).astype(dt)

        @pl.when(op == _PHOTO_IDS["Solarize"])                     # p = threshold
        def _():
            out_ref[...] = jnp.where(x >= p, 255.0 - x, x).astype(dt)

        @pl.when(op == _PHOTO_IDS["Invert"])
        def _():
            out_ref[...] = (255.0 - x).astype(dt)

        @pl.when(op == _PHOTO_IDS["AutoContrast"])
        def _():
            for c in range(C):
                mn = st_ref[c * 8 + 0]
                mx = st_ref[c * 8 + 1]
                degen = mx == mn
                scale = jnp.where(degen, 1.0,
                                  255.0 / jnp.where(degen, 1.0, mx - mn))
                mn0 = jnp.where(degen, 0.0, mn)
                out_ref[pl.ds(c, 1), :] = jnp.floor(
                    jnp.clip((x[c:c + 1] - mn0) * scale, 0.0, 255.0)).astype(dt)

    return kernel


@functools.lru_cache(maxsize=None)
def _build_photometric_call(C, H, W):
    HW = H * W
    HWp, TN = _pad_and_tile(HW, _PHOTO_TILE)
    NT = HWp // TN
    fn = pl.pallas_call(
        _make_photometric_kernel(C, HW),
        out_shape=jax.ShapeDtypeStruct((C, HWp), jnp.bfloat16),
        grid=(NT,),
        in_specs=[pl.BlockSpec(memory_space=pltpu.MemorySpace.SMEM),   # op id (1,) i32
                  pl.BlockSpec(memory_space=pltpu.MemorySpace.SMEM),   # param (1,) f32
                  pl.BlockSpec(memory_space=pltpu.MemorySpace.SMEM),   # stats (C*8,) f32
                  pl.BlockSpec((C, TN), lambda t: (0, t))],
        out_specs=pl.BlockSpec((C, TN), lambda t: (0, t)),
        compiler_params=pltpu.CompilerParams(dimension_semantics=("parallel",)))
    return jax.jit(fn)


def _photo_params(op_name, magnitude):
    op_id = _PHOTO_IDS[op_name]
    if op_name in ("Brightness", "Color", "Contrast"):
        return op_id, 1.0 + magnitude
    if op_name == "Posterize":
        return op_id, float(2 ** (8 - int(magnitude)))
    if op_name == "Solarize":
        return op_id, float(magnitude)
    return op_id, 0.0


def photometric_pallas(img, op_name, magnitude):
    C, H, W = img.shape
    HW = H * W
    x = img.astype(jnp.bfloat16).reshape(C, HW)
    HWp, _ = _pad_and_tile(HW, _PHOTO_TILE)
    xp = jnp.pad(x, ((0, 0), (0, HWp - HW))) if HWp != HW else x
    op_id, param = _photo_params(op_name, magnitude)
    if op_name in ("Contrast", "AutoContrast"):
        stats = _build_photo_stats_call(C, H, W)(xp).reshape(-1)
    else:
        stats = jnp.zeros((C * 8,), jnp.float32)
    out = _build_photometric_call(C, H, W)(
        jnp.asarray([op_id], dtype=jnp.int32),
        jnp.asarray([param], dtype=jnp.float32),
        stats, xp)
    return out[:, :HW].reshape(C, H, W)


# ---------------------------------------------------------------------------
# Kernel 3: Sharpness -- 3x3 blur with XLU rolls, gridded over channels
# ---------------------------------------------------------------------------
def _make_sharpness_kernel(H, W, Hp, Wp):
    def kernel(ratio_ref, img_ref, out_ref):
        ratio = ratio_ref[0]
        x = img_ref[0].astype(jnp.float32)                         # (Hp, Wp)
        rs = x + pltpu.roll(x, 1, 0) + pltpu.roll(x, Hp - 1, 0)
        ns = rs + pltpu.roll(rs, 1, 1) + pltpu.roll(rs, Wp - 1, 1)
        blur = (ns + 4.0 * x) / 13.0                               # (n8 + 5x)/13
        ri = lax.broadcasted_iota(jnp.int32, (Hp, Wp), 0)
        ci = lax.broadcasted_iota(jnp.int32, (Hp, Wp), 1)
        interior = (ri >= 1) & (ri <= H - 2) & (ci >= 1) & (ci <= W - 2)
        degen = jnp.where(interior, jnp.round(blur), x)
        out_ref[0] = jnp.floor(
            jnp.clip(ratio * x + (1.0 - ratio) * degen, 0.0, 255.0)
        ).astype(out_ref.dtype)

    return kernel


@functools.lru_cache(maxsize=None)
def _build_sharpness_call(C, H, W, Hp, Wp):
    # TODO(synk): halo-tile the spatial dims for very large images instead of
    # one (Hp, Wp) block per channel.
    fn = pl.pallas_call(
        _make_sharpness_kernel(H, W, Hp, Wp),
        out_shape=jax.ShapeDtypeStruct((C, Hp, Wp), jnp.bfloat16),
        grid=(C,),
        in_specs=[pl.BlockSpec(memory_space=pltpu.MemorySpace.SMEM),
                  pl.BlockSpec((1, Hp, Wp), lambda c: (c, 0, 0))],
        out_specs=pl.BlockSpec((1, Hp, Wp), lambda c: (c, 0, 0)),
        compiler_params=pltpu.CompilerParams(
            dimension_semantics=("parallel",),
            vmem_limit_bytes=64 * 1024 * 1024))
    return jax.jit(fn)


def sharpness_pallas(img, magnitude):
    C, H, W = img.shape
    Hp = ((H + 7) // 8) * 8
    Wp = ((W + 127) // 128) * 128
    x = img.astype(jnp.bfloat16)
    if (Hp, Wp) != (H, W):
        x = jnp.pad(x, ((0, 0), (0, Hp - H), (0, Wp - W)))
    ratio = jnp.asarray([1.0 + magnitude], dtype=jnp.float32)
    out = _build_sharpness_call(C, H, W, Hp, Wp)(ratio, x)
    return out[:, :H, :W]


# ---------------------------------------------------------------------------
# Kernel 4: Equalize -- (a) tiled histogram + LUT, (b) tiled LUT-gather matmul
# ---------------------------------------------------------------------------
_NB = 256


def _make_equalize_lut_kernel(C, HW, TE, NT):
    def kernel(cols_ref, lut_ref):
        t = pl.program_id(0)

        @pl.when(t == 0)
        def _():
            lut_ref[...] = jnp.zeros_like(lut_ref)

        xc = cols_ref[...].astype(jnp.float32)                     # (TE, C)
        ones_row = jnp.ones((1, TE), jnp.bfloat16)
        bins_lane = lax.broadcasted_iota(jnp.float32, (TE, _NB), 1)
        for c in range(C):
            col = xc[:, c:c + 1]                                   # (TE, 1)
            oh = (bins_lane == col).astype(jnp.bfloat16)           # (TE, NB)
            counts = jnp.dot(ones_row, oh,
                             preferred_element_type=jnp.float32)   # (1, NB)
            lut_ref[pl.ds(c, 1), :] = lut_ref[pl.ds(c, 1), :] + counts

        @pl.when(t == NT - 1)
        def _():
            hist = lut_ref[...]                                    # (C, NB) counts
            jj = lax.broadcasted_iota(jnp.int32, (_NB, _NB), 0)
            ii = lax.broadcasted_iota(jnp.int32, (_NB, _NB), 1)
            ut = (jj < ii).astype(jnp.float32)                     # strict upper tri
            excl = jnp.dot(hist, ut,
                           preferred_element_type=jnp.float32)     # exclusive cumsum
            bins_row = lax.broadcasted_iota(jnp.float32, (1, _NB), 1)
            for c in range(C):
                hr = hist[c:c + 1]
                idx_last = jnp.max(jnp.where(hr > 0.0, bins_row, -1.0))
                last_cnt = jnp.sum(jnp.where(bins_row == idx_last, hr, 0.0))
                step = jnp.floor((float(HW) - last_cnt) / 255.0)
                lut_c = jnp.clip(
                    jnp.floor((excl[c:c + 1] + jnp.floor(step * 0.5))
                              / jnp.maximum(step, 1.0)), 0.0, 255.0)
                # step <= 0 -> identity LUT (channel returned unchanged)
                lut_ref[pl.ds(c, 1), :] = jnp.where(step > 0.0, lut_c, bins_row)

    return kernel


def _make_equalize_apply_kernel(C, TE):
    def kernel(lut_ref, img_ref, out_ref):
        x = img_ref[...].astype(jnp.float32)                       # (C, TE)
        bins_sub = lax.broadcasted_iota(jnp.float32, (_NB, TE), 0)
        for c in range(C):
            row = x[c:c + 1]                                       # (1, TE)
            ohT = (bins_sub == row).astype(jnp.bfloat16)           # (NB, TE)
            lrow = lut_ref[pl.ds(c, 1), :].astype(jnp.bfloat16)    # (1, NB)
            eq = jnp.dot(lrow, ohT,
                         preferred_element_type=jnp.float32)       # (1, TE)
            out_ref[pl.ds(c, 1), :] = eq.astype(out_ref.dtype)

    return kernel


@functools.lru_cache(maxsize=None)
def _build_equalize_lut_call(C, HW, HWp, TE):
    NT = HWp // TE
    fn = pl.pallas_call(
        _make_equalize_lut_kernel(C, HW, TE, NT),
        out_shape=jax.ShapeDtypeStruct((C, _NB), jnp.float32),
        grid=(NT,),
        in_specs=[pl.BlockSpec((TE, C), lambda t: (t, 0))],
        out_specs=pl.BlockSpec((C, _NB), lambda t: (0, 0)),
        compiler_params=pltpu.CompilerParams(dimension_semantics=("arbitrary",)))
    return jax.jit(fn)


@functools.lru_cache(maxsize=None)
def _build_equalize_apply_call(C, HWp, TE):
    NT = HWp // TE
    fn = pl.pallas_call(
        _make_equalize_apply_kernel(C, TE),
        out_shape=jax.ShapeDtypeStruct((C, HWp), jnp.bfloat16),
        grid=(NT,),
        in_specs=[pl.BlockSpec((C, _NB), lambda t: (0, 0)),
                  pl.BlockSpec((C, TE), lambda t: (0, t))],
        out_specs=pl.BlockSpec((C, TE), lambda t: (0, t)),
        compiler_params=pltpu.CompilerParams(dimension_semantics=("parallel",)))
    return jax.jit(fn)


def equalize_pallas(img):
    C, H, W = img.shape
    HW = H * W
    x = img.astype(jnp.bfloat16).reshape(C, HW)
    HWp, TE = _pad_and_tile(HW, _EQ_TILE)
    if HWp != HW:
        x_rows = jnp.pad(x, ((0, 0), (0, HWp - HW)))
        # pad histogram input with -1 so padded pixels never match a bin
        x_cols = jnp.pad(x, ((0, 0), (0, HWp - HW)), constant_values=-1.0).T
    else:
        x_rows = x
        x_cols = x.T
    lut = _build_equalize_lut_call(C, HW, HWp, TE)(x_cols)
    out = _build_equalize_apply_call(C, HWp, TE)(lut, x_rows)
    return out[:, :HW].reshape(C, H, W)


# ---------------------------------------------------------------------------
# op dispatch (mirrors torchvision _apply_op)
# ---------------------------------------------------------------------------
def _apply_op_pallas(img, op_name, magnitude):
    C, H, W = img.shape
    if op_name == "Identity":
        return img
    if op_name in ("ShearX", "ShearY", "TranslateX", "TranslateY", "Rotate"):
        if op_name == "ShearX":
            m = _get_inverse_affine_matrix([-W * 0.5, -H * 0.5], 0.0, [0.0, 0.0], 1.0,
                                           [math.degrees(math.atan(magnitude)), 0.0])
        elif op_name == "ShearY":
            m = _get_inverse_affine_matrix([-W * 0.5, -H * 0.5], 0.0, [0.0, 0.0], 1.0,
                                           [0.0, math.degrees(math.atan(magnitude))])
        elif op_name == "TranslateX":
            m = _get_inverse_affine_matrix([0.0, 0.0], 0.0, [float(int(magnitude)), 0.0],
                                           1.0, [0.0, 0.0])
        elif op_name == "TranslateY":
            m = _get_inverse_affine_matrix([0.0, 0.0], 0.0, [0.0, float(int(magnitude))],
                                           1.0, [0.0, 0.0])
        else:  # Rotate
            m = _get_inverse_affine_matrix([0.0, 0.0], -magnitude, [0.0, 0.0], 1.0,
                                           [0.0, 0.0])
        return affine_nearest_pallas(img, m)
    if op_name == "Equalize":
        return equalize_pallas(img)
    if op_name == "Sharpness":
        return sharpness_pallas(img, magnitude)
    return photometric_pallas(img, op_name, magnitude)


# ---------------------------------------------------------------------------
# RandAugment (forward semantics of the torch module; host RNG for sampling)
# ---------------------------------------------------------------------------
class RandAugmentPallas:
    def __init__(self, num_ops=2, magnitude=9, num_magnitude_bins=31, fill=None):
        self.num_ops = num_ops
        self.magnitude = magnitude
        self.num_magnitude_bins = num_magnitude_bins
        self.fill = fill  # TODO(synk): non-None fill (OOB fill value) not implemented

    def _augmentation_space(self, num_bins, image_size):
        H, W = image_size
        return {
            "Identity": (np.array(0.0), False),
            "ShearX": (np.linspace(0.0, 0.3, num_bins), True),
            "ShearY": (np.linspace(0.0, 0.3, num_bins), True),
            "TranslateX": (np.linspace(0.0, 150.0 / 331.0 * W, num_bins), True),
            "TranslateY": (np.linspace(0.0, 150.0 / 331.0 * H, num_bins), True),
            "Rotate": (np.linspace(0.0, 30.0, num_bins), True),
            "Brightness": (np.linspace(0.0, 0.9, num_bins), True),
            "Color": (np.linspace(0.0, 0.9, num_bins), True),
            "Contrast": (np.linspace(0.0, 0.9, num_bins), True),
            "Sharpness": (np.linspace(0.0, 0.9, num_bins), True),
            "Posterize": (8 - np.round(np.arange(num_bins) / ((num_bins - 1) / 4)).astype(np.int32),
                          False),
            "Solarize": (np.linspace(255.0, 0.0, num_bins), False),
            "AutoContrast": (np.array(0.0), False),
            "Equalize": (np.array(0.0), False),
        }

    def __call__(self, img, seed=0):
        # host-side op/sign sampling: no device->host sync inside the loop
        rng = seed if isinstance(seed, np.random.Generator) else np.random.default_rng(seed)
        img = jnp.asarray(img).astype(jnp.bfloat16)   # carry bf16 between ops
        C, H, W = img.shape
        op_meta = self._augmentation_space(self.num_magnitude_bins, (H, W))
        names = list(op_meta.keys())
        # TODO(synk): batch images / fuse the num_ops chain to amortize per-call
        # launch overhead for tiny images.
        for _ in range(self.num_ops):
            op_index = int(rng.integers(0, len(op_meta)))
            op_name = names[op_index]
            magnitudes, signed = op_meta[op_name]
            magnitude = float(magnitudes[self.magnitude]) if magnitudes.ndim > 0 else 0.0
            if signed and int(rng.integers(0, 2)):
                magnitude *= -1.0
            img = _apply_op_pallas(img, op_name, magnitude)
        return img.astype(jnp.float32)


if __name__ == "__main__":
    key = jax.random.PRNGKey(0)
    key, sub = jax.random.split(key)
    # single RGB image, uint8 values emulated in float32
    img = jax.random.randint(sub, (3, 16, 16), 0, 256, dtype=jnp.int32).astype(jnp.float32)

    aug = RandAugmentPallas(num_ops=2, magnitude=9, num_magnitude_bins=31)
    out = aug(img, seed=0)
    jax.block_until_ready(out)
    assert out.shape == (3, 16, 16) and out.dtype == jnp.float32

    # explicitly exercise the reworked kernels
    rot = _apply_op_pallas(img, "Rotate", 30.0)          # banded index-gather affine
    eq = _apply_op_pallas(img, "Equalize", 0.0)          # tiled hist/LUT + gather
    ac = _apply_op_pallas(img, "AutoContrast", 0.0)      # stats kernel + tiled apply
    jax.block_until_ready((rot, eq, ac))
    assert rot.shape == (3, 16, 16)
    assert eq.shape == (3, 16, 16)
    assert ac.shape == (3, 16, 16)

    print("KERNEL_OK")
</pallas_src>

<mosaic_0001>
module attributes {stable_mosaic.version = 11 : i64} {
  func.func @kernel(%arg0: i32, %arg1: memref<1xi32, #tpu.memory_space<smem>>, %arg2: memref<1xf32, #tpu.memory_space<smem>>, %arg3: memref<24xf32, #tpu.memory_space<smem>>, %arg4: memref<3x256xbf16, #tpu.memory_space<vmem>>, %arg5: memref<3x256xbf16, #tpu.memory_space<vmem>>) attributes {dimension_semantics = [#tpu.dimension_semantics<parallel>], iteration_bounds = array<i64: 1>, scalar_prefetch = 0 : i64, scratch_operands = 0 : i64, tpu.core_type = #tpu.core_type<tc>, window_params = [{transform_indices = @transform_0, window_bounds = array<i64: 1>}, {transform_indices = @transform_1, window_bounds = array<i64: 1>}, {transform_indices = @transform_2, window_bounds = array<i64: 24>}, {transform_indices = @transform_3, window_bounds = array<i64: 3, 256>}, {transform_indices = @transform_4, window_bounds = array<i64: 3, 256>}]} {
    %c0 = arith.constant 0 : index
    %0 = memref.load %arg1[%c0] : memref<1xi32, #tpu.memory_space<smem>>
    %c0_0 = arith.constant 0 : index
    %1 = memref.load %arg2[%c0_0] : memref<1xf32, #tpu.memory_space<smem>>
    %c0_1 = arith.constant 0 : index
    %c0_2 = arith.constant 0 : index
    %2 = vector.load %arg4[%c0_1, %c0_2] : memref<3x256xbf16, #tpu.memory_space<vmem>>, vector<3x256xbf16>
    %3 = arith.extf %2 : vector<3x256xbf16> to vector<3x256xf32>
    %c0_i32 = arith.constant 0 : i32
    %4 = arith.cmpi eq, %0, %c0_i32 : i32
    %5 = arith.extui %4 : i1 to i32
    %c0_i32_3 = arith.constant 0 : i32
    %6 = arith.cmpi ne, %5, %c0_i32_3 : i32
    scf.if %6 {
      %28 = arith.truncf %3 : vector<3x256xf32> to vector<3x256xbf16>
      %c0_11 = arith.constant 0 : index
      %c0_12 = arith.constant 0 : index
      %29 = vector.load %arg5[%c0_11, %c0_12] : memref<3x256xbf16, #tpu.memory_space<vmem>>, vector<3x256xbf16>
      tpu.vector_store %arg5[%c0_11, %c0_12], %28 {strides = array<i32>} : memref<3x256xbf16, #tpu.memory_space<vmem>>, vector<3x256xbf16>,
    } else {
    }
    %c1_i32 = arith.constant 1 : i32
    %7 = arith.cmpi eq, %0, %c1_i32 : i32
    %8 = arith.extui %7 : i1 to i32
    %c0_i32_4 = arith.constant 0 : i32
    %9 = arith.cmpi ne, %8, %c0_i32_4 : i32
    scf.if %9 {
      %28 = vector.broadcast %1 : f32 to vector<3x256xf32>
      %29 = arith.mulf %28, %3 : vector<3x256xf32>
      %cst = arith.constant 1.000000e+00 : f32
      %30 = arith.subf %cst, %1 : f32
      %cst_11 = arith.constant 0.000000e+00 : f32
      %31 = arith.mulf %30, %cst_11 : f32
      %32 = vector.broadcast %31 : f32 to vector<3x256xf32>
      %33 = arith.addf %29, %32 : vector<3x256xf32>
      %cst_12 = arith.constant 0.000000e+00 : f32
      %cst_13 = arith.constant 2.550000e+02 : f32
      %34 = vector.broadcast %cst_12 : f32 to vector<3x256xf32>
      %35 = arith.maximumf %34, %33 : vector<3x256xf32>
      %36 = vector.broadcast %cst_13 : f32 to vector<3x256xf32>
      %37 = arith.minimumf %36, %35 : vector<3x256xf32>
      %38 = math.floor %37 : vector<3x256xf32>
      %39 = arith.truncf %38 : vector<3x256xf32> to vector<3x256xbf16>
      %c0_14 = arith.constant 0 : index
      %c0_15 = arith.constant 0 : index
      %40 = vector.load %arg5[%c0_14, %c0_15] : memref<3x256xbf16, #tpu.memory_space<vmem>>, vector<3x256xbf16>
      tpu.vector_store %arg5[%c0_14, %c0_15], %39 {strides = array<i32>} : memref<3x256xbf16, #tpu.memory_space<vmem>>, vector<3x256xbf16>,
    } else {
    }
    %c2_i32 = arith.constant 2 : i32
    %10 = arith.cmpi eq, %0, %c2_i32 : i32
    %11 = arith.extui %10 : i1 to i32
    %c0_i32_5 = arith.constant 0 : i32
    %12 = arith.cmpi ne, %11, %c0_i32_5 : i32
    scf.if %12 {
      %28 = vector.extract_strided_slice %3 {offsets = [0, 0], sizes = [1, 256], strides = [1, 1]} : vector<3x256xf32> to vector<1x256xf32>
      %cst = arith.constant 2.989000e-01 : f32
      %29 = vector.broadcast %cst : f32 to vector<1x256xf32>
      %30 = arith.mulf %29, %28 : vector<1x256xf32>
      %31 = vector.extract_strided_slice %3 {offsets = [1, 0], sizes = [1, 256], strides = [1, 1]} : vector<3x256xf32> to vector<1x256xf32>
      %cst_11 = arith.constant 5.870000e-01 : f32
      %32 = vector.broadcast %cst_11 : f32 to vector<1x256xf32>
      %33 = arith.mulf %32, %31 : vector<1x256xf32>
      %34 = arith.addf %30, %33 : vector<1x256xf32>
      %35 = vector.extract_strided_slice %3 {offsets = [2, 0], sizes = [1, 256], strides = [1, 1]} : vector<3x256xf32> to vector<1x256xf32>
      %cst_12 = arith.constant 1.140000e-01 : f32
      %36 = vector.broadcast %cst_12 : f32 to vector<1x256xf32>
      %37 = arith.mulf %36, %35 : vector<1x256xf32>
      %38 = arith.addf %34, %37 : vector<1x256xf32>
      %39 = math.floor %38 : vector<1x256xf32>
      %40 = vector.broadcast %1 : f32 to vector<3x256xf32>
      %41 = arith.mulf %40, %3 : vector<3x256xf32>
      %cst_13 = arith.constant 1.000000e+00 : f32
      %42 = arith.subf %cst_13, %1 : f32
      %43 = vector.broadcast %42 : f32 to vector<1x256xf32>
      %44 = arith.mulf %43, %39 : vector<1x256xf32>
      %45 = vector.broadcast %44 : vector<1x256xf32> to vector<3x256xf32>
      %46 = arith.addf %41, %45 : vector<3x256xf32>
      %cst_14 = arith.constant 0.000000e+00 : f32
      %cst_15 = arith.constant 2.550000e+02 : f32
      %47 = vector.broadcast %cst_14 : f32 to vector<3x256xf32>
      %48 = arith.maximumf %47, %46 : vector<3x256xf32>
      %49 = vector.broadcast %cst_15 : f32 to vector<3x256xf32>
      %50 = arith.minimumf %49, %48 : vector<3x256xf32>
      %51 = math.floor %50 : vector<3x256xf32>
      %52 = arith.truncf %51 : vector<3x256xf32> to vector<3x256xbf16>
      %c0_16 = arith.constant 0 : index
      %c0_17 = arith.constant 0 : index
      %53 = vector.load %arg5[%c0_16, %c0_17] : memref<3x256xbf16, #tpu.memory_space<vmem>>, vector<3x256xbf16>
      tpu.vector_store %arg5[%c0_16, %c0_17], %52 {strides = array<i32>} : memref<3x256xbf16, #tpu.memory_space<vmem>>, vector<3x256xbf16>,
    } else {
    }
    %c3_i32 = arith.constant 3 : i32
    %13 = arith.cmpi eq, %0, %c3_i32 : i32
    %14 = arith.extui %13 : i1 to i32
    %c0_i32_6 = arith.constant 0 : i32
    %15 = arith.cmpi ne, %14, %c0_i32_6 : i32
    scf.if %15 {
      %c2 = arith.constant 2 : index
      %28 = memref.load %arg3[%c2] : memref<24xf32, #tpu.memory_space<smem>>
      %cst = arith.constant 2.560000e+02 : f32
      %29 = arith.divf %28, %cst : f32
      %30 = vector.broadcast %1 : f32 to vector<3x256xf32>
      %31 = arith.mulf %30, %3 : vector<3x256xf32>
      %cst_11 = arith.constant 1.000000e+00 : f32
      %32 = arith.subf %cst_11, %1 : f32
      %33 = arith.mulf %32, %29 : f32
      %34 = vector.broadcast %33 : f32 to vector<3x256xf32>
      %35 = arith.addf %31, %34 : vector<3x256xf32>
      %cst_12 = arith.constant 0.000000e+00 : f32
      %cst_13 = arith.constant 2.550000e+02 : f32
      %36 = vector.broadcast %cst_12 : f32 to vector<3x256xf32>
      %37 = arith.maximumf %36, %35 : vector<3x256xf32>
      %38 = vector.broadcast %cst_13 : f32 to vector<3x256xf32>
      %39 = arith.minimumf %38, %37 : vector<3x256xf32>
      %40 = math.floor %39 : vector<3x256xf32>
      %41 = arith.truncf %40 : vector<3x256xf32> to vector<3x256xbf16>
      %c0_14 = arith.constant 0 : index
      %c0_15 = arith.constant 0 : index
      %42 = vector.load %arg5[%c0_14, %c0_15] : memref<3x256xbf16, #tpu.memory_space<vmem>>, vector<3x256xbf16>
      tpu.vector_store %arg5[%c0_14, %c0_15], %41 {strides = array<i32>} : memref<3x256xbf16, #tpu.memory_space<vmem>>, vector<3x256xbf16>,
    } else {
    }
    %c4_i32 = arith.constant 4 : i32
    %16 = arith.cmpi eq, %0, %c4_i32 : i32
    %17 = arith.extui %16 : i1 to i32
    %c0_i32_7 = arith.constant 0 : i32
    %18 = arith.cmpi ne, %17, %c0_i32_7 : i32
    scf.if %18 {
      %28 = vector.broadcast %1 : f32 to vector<3x256xf32>
      %29 = arith.divf %3, %28 : vector<3x256xf32>
      %30 = math.floor %29 : vector<3x256xf32>
      %31 = vector.broadcast %1 : f32 to vector<3x256xf32>
      %32 = arith.mulf %30, %31 : vector<3x256xf32>
      %33 = arith.truncf %32 : vector<3x256xf32> to vector<3x256xbf16>
      %c0_11 = arith.constant 0 : index
      %c0_12 = arith.constant 0 : index
      %34 = vector.load %arg5[%c0_11, %c0_12] : memref<3x256xbf16, #tpu.memory_space<vmem>>, vector<3x256xbf16>
      tpu.vector_store %arg5[%c0_11, %c0_12], %33 {strides = array<i32>} : memref<3x256xbf16, #tpu.memory_space<vmem>>, vector<3x256xbf16>,
    } else {
    }
    %c5_i32 = arith.constant 5 : i32
    %19 = arith.cmpi eq, %0, %c5_i32 : i32
    %20 = arith.extui %19 : i1 to i32
    %c0_i32_8 = arith.constant 0 : i32
    %21 = arith.cmpi ne, %20, %c0_i32_8 : i32
    scf.if %21 {
      %28 = vector.broadcast %1 : f32 to vector<3x256xf32>
      %29 = arith.cmpf oge, %3, %28 : vector<3x256xf32>
      %cst = arith.constant 2.550000e+02 : f32
      %30 = vector.broadcast %cst : f32 to vector<3x256xf32>
      %31 = arith.subf %30, %3 : vector<3x256xf32>
      %32 = arith.select %29, %31, %3 : vector<3x256xi1>, vector<3x256xf32>
      %33 = arith.truncf %32 : vector<3x256xf32> to vector<3x256xbf16>
      %c0_11 = arith.constant 0 : index
      %c0_12 = arith.constant 0 : index
      %34 = vector.load %arg5[%c0_11, %c0_12] : memref<3x256xbf16, #tpu.memory_space<vmem>>, vector<3x256xbf16>
      tpu.vector_store %arg5[%c0_11, %c0_12], %33 {strides = array<i32>} : memref<3x256xbf16, #tpu.memory_space<vmem>>, vector<3x256xbf16>,
    } else {
    }
    %c6_i32 = arith.constant 6 : i32
    %22 = arith.cmpi eq, %0, %c6_i32 : i32
    %23 = arith.extui %22 : i1 to i32
    %c0_i32_9 = arith.constant 0 : i32
    %24 = arith.cmpi ne, %23, %c0_i32_9 : i32
    scf.if %24 {
      %cst = arith.constant 2.550000e+02 : f32
      %28 = vector.broadcast %cst : f32 to vector<3x256xf32>
      %29 = arith.subf %28, %3 : vector<3x256xf32>
      %30 = arith.truncf %29 : vector<3x256xf32> to vector<3x256xbf16>
      %c0_11 = arith.constant 0 : index
      %c0_12 = arith.constant 0 : index
      %31 = vector.load %arg5[%c0_11, %c0_12] : memref<3x256xbf16, #tpu.memory_space<vmem>>, vector<3x256xbf16>
      tpu.vector_store %arg5[%c0_11, %c0_12], %30 {strides = array<i32>} : memref<3x256xbf16, #tpu.memory_space<vmem>>, vector<3x256xbf16>,
    } else {
    }
    %c7_i32 = arith.constant 7 : i32
    %25 = arith.cmpi eq, %0, %c7_i32 : i32
    %26 = arith.extui %25 : i1 to i32
    %c0_i32_10 = arith.constant 0 : i32
    %27 = arith.cmpi ne, %26, %c0_i32_10 : i32
    scf.if %27 {
      %c0_11 = arith.constant 0 : index
      %28 = memref.load %arg3[%c0_11] : memref<24xf32, #tpu.memory_space<smem>>
      %c1 = arith.constant 1 : index
      %29 = memref.load %arg3[%c1] : memref<24xf32, #tpu.memory_space<smem>>
      %30 = arith.cmpf oeq, %29, %28 : f32
      %31 = arith.subf %29, %28 : f32
      %cst = arith.constant 1.000000e+00 : f32
      %32 = arith.select %30, %cst, %31 : f32
      %cst_12 = arith.constant 2.550000e+02 : f32
      %33 = arith.divf %cst_12, %32 : f32
      %cst_13 = arith.constant 1.000000e+00 : f32
      %34 = arith.select %30, %cst_13, %33 : f32
      %cst_14 = arith.constant 0.000000e+00 : f32
      %35 = arith.select %30, %cst_14, %28 : f32
      %36 = vector.extract_strided_slice %3 {offsets = [0, 0], sizes = [1, 256], strides = [1, 1]} : vector<3x256xf32> to vector<1x256xf32>
      %37 = vector.broadcast %35 : f32 to vector<1x256xf32>
      %38 = arith.subf %36, %37 : vector<1x256xf32>
      %39 = vector.broadcast %34 : f32 to vector<1x256xf32>
      %40 = arith.mulf %38, %39 : vector<1x256xf32>
      %cst_15 = arith.constant 0.000000e+00 : f32
      %cst_16 = arith.constant 2.550000e+02 : f32
      %41 = vector.broadcast %cst_15 : f32 to vector<1x256xf32>
      %42 = arith.maximumf %41, %40 : vector<1x256xf32>
      %43 = vector.broadcast %cst_16 : f32 to vector<1x256xf32>
      %44 = arith.minimumf %43, %42 : vector<1x256xf32>
      %45 = math.floor %44 : vector<1x256xf32>
      %46 = arith.truncf %45 : vector<1x256xf32> to vector<1x256xbf16>
      %c0_17 = arith.constant 0 : index
      %c0_18 = arith.constant 0 : index
      %47 = vector.load %arg5[%c0_17, %c0_18] : memref<3x256xbf16, #tpu.memory_space<vmem>>, vector<1x256xbf16>
      tpu.vector_store %arg5[%c0_17, %c0_18], %46 {strides = array<i32>} : memref<3x256xbf16, #tpu.memory_space<vmem>>, vector<1x256xbf16>,
      %c8 = arith.constant 8 : index
      %48 = memref.load %arg3[%c8] : memref<24xf32, #tpu.memory_space<smem>>
      %c9 = arith.constant 9 : index
      %49 = memref.load %arg3[%c9] : memref<24xf32, #tpu.memory_space<smem>>
      %50 = arith.cmpf oeq, %49, %48 : f32
      %51 = arith.subf %49, %48 : f32
      %cst_19 = arith.constant 1.000000e+00 : f32
      %52 = arith.select %50, %cst_19, %51 : f32
      %cst_20 = arith.constant 2.550000e+02 : f32
      %53 = arith.divf %cst_20, %52 : f32
      %cst_21 = arith.constant 1.000000e+00 : f32
      %54 = arith.select %50, %cst_21, %53 : f32
      %cst_22 = arith.constant 0.000000e+00 : f32
      %55 = arith.select %50, %cst_22, %48 : f32
      %56 = vector.extract_strided_slice %3 {offsets = [1, 0], sizes = [1, 256], strides = [1, 1]} : vector<3x256xf32> to vector<1x256xf32>
      %57 = vector.broadcast %55 : f32 to vector<1x256xf32>
      %58 = arith.subf %56, %57 : vector<1x256xf32>
      %59 = vector.broadcast %54 : f32 to vector<1x256xf32>
      %60 = arith.mulf %58, %59 : vector<1x256xf32>
      %cst_23 = arith.constant 0.000000e+00 : f32
      %cst_24 = arith.constant 2.550000e+02 : f32
      %61 = vector.broadcast %cst_23 : f32 to vector<1x256xf32>
      %62 = arith.maximumf %61, %60 : vector<1x256xf32>
      %63 = vector.broadcast %cst_24 : f32 to vector<1x256xf32>
      %64 = arith.minimumf %63, %62 : vector<1x256xf32>
      %65 = math.floor %64 : vector<1x256xf32>
      %66 = arith.truncf %65 : vector<1x256xf32> to vector<1x256xbf16>
      %c1_25 = arith.constant 1 : index
      %c0_26 = arith.constant 0 : index
      %67 = vector.load %arg5[%c1_25, %c0_26] : memref<3x256xbf16, #tpu.memory_space<vmem>>, vector<1x256xbf16>
      tpu.vector_store %arg5[%c1_25, %c0_26], %66 {strides = array<i32>} : memref<3x256xbf16, #tpu.memory_space<vmem>>, vector<1x256xbf16>,
      %c16 = arith.constant 16 : index
      %68 = memref.load %arg3[%c16] : memref<24xf32, #tpu.memory_space<smem>>
      %c17 = arith.constant 17 : index
      %69 = memref.load %arg3[%c17] : memref<24xf32, #tpu.memory_space<smem>>
      %70 = arith.cmpf oeq, %69, %68 : f32
      %71 = arith.subf %69, %68 : f32
      %cst_27 = arith.constant 1.000000e+00 : f32
      %72 = arith.select %70, %cst_27, %71 : f32
      %cst_28 = arith.constant 2.550000e+02 : f32
      %73 = arith.divf %cst_28, %72 : f32
      %cst_29 = arith.constant 1.000000e+00 : f32
      %74 = arith.select %70, %cst_29, %73 : f32
      %cst_30 = arith.constant 0.000000e+00 : f32
      %75 = arith.select %70, %cst_30, %68 : f32
      %76 = vector.extract_strided_slice %3 {offsets = [2, 0], sizes = [1, 256], strides = [1, 1]} : vector<3x256xf32> to vector<1x256xf32>
      %77 = vector.broadcast %75 : f32 to vector<1x256xf32>
      %78 = arith.subf %76, %77 : vector<1x256xf32>
      %79 = vector.broadcast %74 : f32 to vector<1x256xf32>
      %80 = arith.mulf %78, %79 : vector<1x256xf32>
      %cst_31 = arith.constant 0.000000e+00 : f32
      %cst_32 = arith.constant 2.550000e+02 : f32
      %81 = vector.broadcast %cst_31 : f32 to vector<1x256xf32>
      %82 = arith.maximumf %81, %80 : vector<1x256xf32>
      %83 = vector.broadcast %cst_32 : f32 to vector<1x256xf32>
      %84 = arith.minimumf %83, %82 : vector<1x256xf32>
      %85 = math.floor %84 : vector<1x256xf32>
      %86 = arith.truncf %85 : vector<1x256xf32> to vector<1x256xbf16>
      %c2 = arith.constant 2 : index
      %c0_33 = arith.constant 0 : index
      %87 = vector.load %arg5[%c2, %c0_33] : memref<3x256xbf16, #tpu.memory_space<vmem>>, vector<1x256xbf16>
      tpu.vector_store %arg5[%c2, %c0_33], %86 {strides = array<i32>} : memref<3x256xbf16, #tpu.memory_space<vmem>>, vector<1x256xbf16>,
    } else {
    }
    return
  }
  func.func @transform_0(%arg0: i32) -> i32 {
    %c0_i32 = arith.constant 0 : i32
    %c0_i32_0 = arith.constant 0 : i32
    return %c0_i32 : i32
  }
  func.func @transform_1(%arg0: i32) -> i32 {
    %c0_i32 = arith.constant 0 : i32
    %c0_i32_0 = arith.constant 0 : i32
    return %c0_i32 : i32
  }
  func.func @transform_2(%arg0: i32) -> i32 {
    %c0_i32 = arith.constant 0 : i32
    %c0_i32_0 = arith.constant 0 : i32
    return %c0_i32 : i32
  }
  func.func @transform_3(%arg0: i32) -> (i32, i32) {
    %c0_i32 = arith.constant 0 : i32
    %c0_i32_0 = arith.constant 0 : i32
    return %c0_i32, %arg0 : i32, i32
  }
  func.func @transform_4(%arg0: i32) -> (i32, i32) {
    %c0_i32 = arith.constant 0 : i32
    %c0_i32_0 = arith.constant 0 : i32
    return %c0_i32, %arg0 : i32, i32
  }
}

</mosaic_0001>

<bundles_post_ra>
// kernel: tpu_custom_call.1
= control target key start
LH: loop header
LB: loop body
LE: loop exit
PB: predicated region body
PF: predicated region fallthrough
CT: control target
= control target key end

     0   :  { %11 = vsyncpa [#allocation6], 0  ;;  %s749_s0 = inlined_call_operand.<no memory space> [shape: s32[1], index: 0, kind: input, shape index: {}]   ;;  %s750_s1 = inlined_call_operand.<no memory space> [shape: f32[1], index: 1, kind: input, shape index: {}]   ;;  %s751_s2 = inlined_call_operand.hbm [shape: f32[24], index: 2, kind: input, shape index: {}]   ;;  %s752_s3 = inlined_call_operand.vmem [shape: bf16[3,256], index: 3, kind: input, shape index: {}]   ;;  %s753_s4 = inlined_call_operand.hbm [shape: bf16[3,256], index: 4, kind: output, shape index: {}]  }
   0x1   :  { %12 = vsyncpa [#allocation5], 0  ;;  %s22_s17 = sshll.u32 %s751_s2, 4  ;;  %s562_s18 = smov [#allocation4]   ;;  %s23_s17 = int_to_ptr.hbm [resolvable:$true] %s22_s17 }
   0x2   :  { %25 = dma.hbm_to_smem %s23_s17, 16, %s562_s18, [#allocation6]  }
   0x3   :  { %558 = dma.done.wait [#allocation6], 16  }
   0x4   :  { %559 = vsyncadd [#allocation6], 4294967280 }
   0x5   :  { %32 = sfence }
   0x6   :  { %v35_v0 = vld [vmem:[%s752_s3] sm:$0xf]  ;;  %p485_p0 = scmp.ne.s32.totalorder %s749_s0, 0 }
   0x7   :  { %v596_v1 = vunpack.c.l.bf16 %v35_v0 }
   0x8   :  { %40 = sbr.rel (%p485_p0) target bundleno = 19 (0x13), region = 25 }
   0xd   :  { %vm41_vm0 = vcmask 1041408   ;;  %vm42_vm1 = vsmask.f32 1280  ;;  %vm44_vm2 = vcmask 1043458   ;;  %vm45_vm3 = vsmask.f32 3328 }
   0xe   :  { %vm43_vm4 = vmand %vm41_vm0, %vm42_vm1  ;;  %v48_v2 = vld [vmem:[#allocation7] sm:$0xf] }
   0xf   :  { %vm46_vm5 = vmand %vm44_vm2, %vm45_vm3 }
  0x10   :  { %vm47_vm6 = vmor %vm46_vm5, %vm43_vm4 }
  0x11   :  { %v49_v3 = vsel %vm47_vm6, %v35_v0, %v48_v2 }
  0x12   :  { %50 = vst [vmem:[#allocation7] sm:$0xf] %v49_v3 }
  0x13 PF:  { %p486_p1 = scmp.ne.s32.totalorder %s749_s0, 1 }
  0x14   :  { %s57_s27 = ssub.f32 (!%p486_p1), 1.0, %s750_s1 }
  0x15   :  { %54 = sbr.rel (%p486_p1) target bundleno = 52 (0x34), region = 29 }
  0x16   :  { %s58_s28 = smul.f32 (!%p486_p1), 0.0, %s57_s27 }
  0x1a   :  { %v55_v4 = vstv %s750_s1  ;;  %v59_v6 = vstv %s58_s28  ;;  %vm73_vm7 = vcmask 1041408   ;;  %vm79_vm8 = vsmask.f32 1280  ;;  %v85_v15 = vld [vmem:[#allocation7] sm:$0xf] }
  0x1b   :  { %v56_v5 = vmul.f32 %v55_v4, %v596_v1  ;;  %vm81_vm9 = vcmask 1043458   ;;  %vm82_vm10 = vsmask.f32 3328  ;;  %vm80_vm11 = vmand %vm73_vm7, %vm79_vm8 }
  0x1c   :  { %vm83_vm12 = vmand %vm81_vm9, %vm82_vm10 }
  0x1d   :  { %v60_v7 = vadd.f32 %v59_v6, %v56_v5  ;;  %vm84_vm13 = vmor %vm83_vm12, %vm80_vm11 }
  0x1f   :  { %v61_v8 = vmax.f32 %v60_v7, 0.0 }
  0x21   :  { %v62_v9 = vmin.f32 %v61_v8, 255.0 }
  0x23   :  { %v63_v10 = vfloor.f32 %v62_v9 }
  0x25   :  { %65 = vst [vmem:[#allocation1] ss:$2 sm:$0xff] %v63_v10 }
  0x2c   :  { %v66_v11 = vld.sshfl [vmem:[#allocation1] sm:$0xff pattern:$0x75316420]  ;;  %v67_v12 = vld.sshfl [vmem:[#allocation1 + $0x8] sm:$0xff pattern:$0x75316420] }
  0x2d   :  { %v70_v13 = vpack.c.bf16 %v67_v12, %v66_v11 }
  0x2f   :  { %v72_v14 = vrot.slane %v70_v13, 2 }
  0x31   :  { %v76_v16 = vsel %vm73_vm7, %v70_v13, %v72_v14 }
  0x32   :  { %v86_v17 = vsel %vm84_vm13, %v76_v16, %v85_v15 }
  0x33   :  { %87 = vst [vmem:[#allocation7] sm:$0xf] %v86_v17 }
  0x34 PF:  { %p487_p2 = scmp.ne.s32.totalorder %s749_s0, 2 }
  0x35   :  { %s108_s7 = ssub.f32 (!%p487_p2), 1.0, %s750_s1 }
  0x36   :  { %91 = sbr.rel (%p487_p2) target bundleno = 101 (0x65), region = 33 }
  0x3b   :  { %v92_v18 = vmul.f32 0.2989, %v596_v1  ;;  %v93_v19 = vmul.f32 0.587, %v596_v1  ;;  %v99_v20 = vmul.f32 0.114, %v596_v1  ;;  %v109_v25 = vstv %s108_s7 }
  0x3c   :  { %v106_v28 = vstv %s750_s1  ;;  %vm121_vm14 = vcmask 1043456   ;;  %vm137_vm15 = vcmask 1041408   ;;  %vm143_vm0 = vsmask.f32 1280  ;;  %v149_v44 = vld [vmem:[#allocation7] sm:$0xf] }
  0x3d   :  { %v488_v21 = vrot.slane %v93_v19, 9  ;;  %v489_v22 = vrot.slane %v99_v20, 10  ;;  %v107_v33 = vmul.f32 %v106_v28, %v596_v1  ;;  %vm145_vm1 = vcmask 1043458   ;;  %vm144_vm3 = vmand %vm137_vm15, %vm143_vm0 }
  0x3e   :  { %vm146_vm2 = vsmask.f32 3328 }
  0x3f   :  { %v98_v23 = vadd.f32 %v488_v21, %v92_v18  ;;  %vm147_vm4 = vmand %vm145_vm1, %vm146_vm2 }
  0x40   :  { %vm148_vm5 = vmor %vm147_vm4, %vm144_vm3 }
  0x41   :  { %v104_v24 = vadd.f32 %v489_v22, %v98_v23 }
  0x43   :  { %v105_v26 = vfloor.f32 %v104_v24 }
  0x45   :  { %v110_v27 = vmul.f32 %v109_v25, %v105_v26 }
  0x47   :  { %v112_v29 = vperm.slane %v110_v27, 0  ;;  %v113_v30 = vperm.slane %v110_v27, 4 }
  0x49   :  { %v116_v31 = vperm.slane %v112_v29, 0  ;;  %v117_v32 = vperm.slane %v113_v30, 0 }
  0x4b   :  { %v120_v34 = vrot.slane %v117_v32, 4 }
  0x4d   :  { %v122_v35 = vsel %vm121_vm14, %v116_v31, %v120_v34 }
  0x4e   :  { %v124_v36 = vadd.f32 %v122_v35, %v107_v33 }
  0x50   :  { %v125_v37 = vmax.f32 %v124_v36, 0.0 }
  0x52   :  { %v126_v38 = vmin.f32 %v125_v37, 255.0 }
  0x54   :  { %v127_v39 = vfloor.f32 %v126_v38 }
  0x56   :  { %129 = vst [vmem:[#allocation1] ss:$2 sm:$0xff] %v127_v39 }
  0x5d   :  { %v130_v40 = vld.sshfl [vmem:[#allocation1] sm:$0xff pattern:$0x75316420]  ;;  %v131_v41 = vld.sshfl [vmem:[#allocation1 + $0x8] sm:$0xff pattern:$0x75316420] }
  0x5e   :  { %v134_v42 = vpack.c.bf16 %v131_v41, %v130_v40 }
  0x60   :  { %v136_v43 = vrot.slane %v134_v42, 2 }
  0x62   :  { %v140_v45 = vsel %vm137_vm15, %v134_v42, %v136_v43 }
  0x63   :  { %v150_v46 = vsel %vm148_vm5, %v140_v45, %v149_v44 }
  0x64   :  { %151 = vst [vmem:[#allocation7] sm:$0xf] %v150_v46 }
  0x65 PF:  { %p490_p3 = scmp.ne.s32.totalorder %s749_s0, 3 }
  0x66   :  { %s491_s12 = sld [smem:[#allocation4 + $0x2]] (!%p490_p3) }
  0x67   :  { %155 = sbr.rel (%p490_p3) target bundleno = 203 (0xcb), region = 37  ;;  %s168_s17 = ssub.f32 (!%p490_p3), 1.0, %s750_s1 }
  0x6c   :  { %v563_v47 = vmov 256.0   ;;  %v166_v54 = vstv %s750_s1  ;;  %vm184_vm7 = vcmask 1041408   ;;  %vm190_vm8 = vsmask.f32 1280  ;;  %v196_v2 = vld [vmem:[#allocation7] sm:$0xf] }
  0x6d   :  { %512 = vrcp.f32 %v563_v47  ;;  %v167_v55 = vmul.f32 %v166_v54, %v596_v1  ;;  %vm192_vm9 = vcmask 1043458   ;;  %vm193_vm10 = vsmask.f32 3328  ;;  %vm191_vm11 = vmand %vm184_vm7, %vm190_vm8 }
  0x6e   :  { %vm194_vm12 = vmand %vm192_vm9, %vm193_vm10 }
  0x6f   :  { %vm195_vm13 = vmor %vm194_vm12, %vm191_vm11 }
  0x73   :  { %v513_v48 = vpop.eup %512 }
  0x74   :  { %v158_v49 = vmul.f32 256.0, %v513_v48  ;;  %vm162_vm6 = vweird.f32 %v513_v48 }
  0x76   :  { %v159_v50 = vsub.f32 1.0, %v158_v49 }
  0x78   :  { %v160_v51 = vmul.f32 %v513_v48, %v159_v50 }
  0x7a   :  { %v161_v52 = vadd.f32 %v513_v48, %v160_v51 }
  0x7c   :  { %v163_v53 = vsel %vm162_vm6, %v513_v48, %v161_v52 }
  0x7d   :  { %501 = vpush %v163_v53 }
  0xae   :  { %s502_s18 = spop %501 }
  0xaf   :  { %s165_s19 = smul.f32 %s502_s18, %s491_s12 }
  0xb1   :  { %s169_s20 = smul.f32 %s168_s17, %s165_s19 }
  0xb3   :  { %v170_v56 = vstv %s169_s20 }
  0xb4   :  { %v171_v57 = vadd.f32 %v170_v56, %v167_v55 }
  0xb6   :  { %v172_v58 = vmax.f32 %v171_v57, 0.0 }
  0xb8   :  { %v173_v59 = vmin.f32 %v172_v58, 255.0 }
  0xba   :  { %v174_v60 = vfloor.f32 %v173_v59 }
  0xbc   :  { %176 = vst [vmem:[#allocation1] ss:$2 sm:$0xff] %v174_v60 }
  0xc3   :  { %v177_v61 = vld.sshfl [vmem:[#allocation1] sm:$0xff pattern:$0x75316420]  ;;  %v178_v62 = vld.sshfl [vmem:[#allocation1 + $0x8] sm:$0xff pattern:$0x75316420] }
  0xc4   :  { %v181_v63 = vpack.c.bf16 %v178_v62, %v177_v61 }
  0xc6   :  { %v183_v0 = vrot.slane %v181_v63, 2 }
  0xc8   :  { %v187_v3 = vsel %vm184_vm7, %v181_v63, %v183_v0 }
  0xc9   :  { %v197_v4 = vsel %vm195_vm13, %v187_v3, %v196_v2 }
  0xca   :  { %198 = vst [vmem:[#allocation7] sm:$0xf] %v197_v4 }
  0xcb PF:  { %p492_p4 = scmp.ne.s32.totalorder %s749_s0, 4 }
  0xcd   :  { %202 = sbr.rel (%p492_p4) target bundleno = 249 (0xf9), region = 41 }
  0xd2   :  { %v203_v5 = vstv %s750_s1  ;;  %vm230_vm2 = vcmask 1041408   ;;  %vm236_vm3 = vsmask.f32 1280  ;;  %vm238_vm4 = vcmask 1043458   ;;  %v242_v23 = vld [vmem:[#allocation7] sm:$0xf] }
  0xd3   :  { %514 = vrcp.f32 %v203_v5  ;;  %v215_v8 = vand.u32 2147483648, %v203_v5  ;;  %vm209_vm14 = vweird.f32 %v203_v5  ;;  %v213_v10 = vand.u32 2147483647, %v203_v5  ;;  %vm237_vm6 = vmand %vm230_vm2, %vm236_vm3 }
  0xd4   :  { %vm239_vm5 = vsmask.f32 3328 }
  0xd5   :  { %v216_v12 = vor.u32 1.1754944e-38, %v215_v8  ;;  %vm214_vm1 = vcmp.eq.f32.partialorder %v213_v10, 8.507059e+37  ;;  %vm240_vm7 = vmand %vm238_vm4, %vm239_vm5 }
  0xd6   :  { %vm241_vm8 = vmor %vm240_vm7, %vm237_vm6 }
  0xd9   :  { %v515_v6 = vpop.eup %514 }
  0xda   :  { %v205_v7 = vmul.f32 %v515_v6, %v203_v5  ;;  %vm210_vm15 = vweird.f32 %v515_v6 }
  0xdb   :  { %vm211_vm0 = vmor %vm209_vm14, %vm210_vm15 }
  0xdc   :  { %v206_v9 = vsub.f32 1.0, %v205_v7 }
  0xde   :  { %v207_v11 = vmul.f32 %v515_v6, %v206_v9 }
  0xe0   :  { %v208_v13 = vadd.f32 %v515_v6, %v207_v11 }
  0xe2   :  { %v212_v14 = vsel %vm211_vm0, %v515_v6, %v208_v13 }
  0xe3   :  { %v217_v15 = vsel %vm214_vm1, %v216_v12, %v212_v14 }
  0xe4   :  { %v218_v16 = vmul.f32 %v217_v15, %v596_v1 }
  0xe6   :  { %v219_v17 = vfloor.f32 %v218_v16 }
  0xe8   :  { %v220_v18 = vmul.f32 %v219_v17, %v203_v5 }
  0xea   :  { %222 = vst [vmem:[#allocation1] ss:$2 sm:$0xff] %v220_v18 }
  0xf1   :  { %v223_v19 = vld.sshfl [vmem:[#allocation1] sm:$0xff pattern:$0x75316420]  ;;  %v224_v20 = vld.sshfl [vmem:[#allocation1 + $0x8] sm:$0xff pattern:$0x75316420] }
  0xf2   :  { %v227_v21 = vpack.c.bf16 %v224_v20, %v223_v19 }
  0xf4   :  { %v229_v22 = vrot.slane %v227_v21, 2 }
  0xf6   :  { %v233_v24 = vsel %vm230_vm2, %v227_v21, %v229_v22 }
  0xf7   :  { %v243_v25 = vsel %vm241_vm8, %v233_v24, %v242_v23 }
  0xf8   :  { %244 = vst [vmem:[#allocation7] sm:$0xf] %v243_v25 }
  0xf9 PF:  { %p493_p5 = scmp.ne.s32.totalorder %s749_s0, 5 }
  0xfb   :  { %248 = sbr.rel (%p493_p5) target bundleno = 274 (0x112), region = 45 }
 0x100   :  { %v249_v26 = vstv %s750_s1  ;;  %v251_v27 = vsub.f32 255.0, %v596_v1  ;;  %vm262_vm10 = vcmask 1041408   ;;  %vm268_vm11 = vsmask.f32 1280  ;;  %v274_v33 = vld [vmem:[#allocation7] sm:$0xf] }
 0x101   :  { %vm250_vm9 = vcmp.ge.f32.partialorder %v596_v1, %v249_v26  ;;  %vm270_vm12 = vcmask 1043458   ;;  %vm271_vm13 = vsmask.f32 3328  ;;  %vm269_vm14 = vmand %vm262_vm10, %vm268_vm11 }
 0x102   :  { %v252_v28 = vsel %vm250_vm9, %v251_v27, %v596_v1  ;;  %vm272_vm15 = vmand %vm270_vm12, %vm271_vm13 }
 0x103   :  { %254 = vst [vmem:[#allocation1] ss:$2 sm:$0xff] %v252_v28  ;;  %vm273_vm0 = vmor %vm272_vm15, %vm269_vm14 }
 0x10a   :  { %v255_v29 = vld.sshfl [vmem:[#allocation1] sm:$0xff pattern:$0x75316420]  ;;  %v256_v30 = vld.sshfl [vmem:[#allocation1 + $0x8] sm:$0xff pattern:$0x75316420] }
 0x10b   :  { %v259_v31 = vpack.c.bf16 %v256_v30, %v255_v29 }
 0x10d   :  { %v261_v32 = vrot.slane %v259_v31, 2 }
 0x10f   :  { %v265_v34 = vsel %vm262_vm10, %v259_v31, %v261_v32 }
 0x110   :  { %v275_v35 = vsel %vm273_vm0, %v265_v34, %v274_v33 }
 0x111   :  { %276 = vst [vmem:[#allocation7] sm:$0xf] %v275_v35 }
 0x112 PF:  { %p494_p6 = scmp.ne.s32.totalorder %s749_s0, 6 }
 0x114   :  { %280 = sbr.rel (%p494_p6) target bundleno = 298 (0x12a), region = 49 }
 0x119   :  { %v281_v36 = vsub.f32 255.0, %v596_v1  ;;  %vm291_vm1 = vcmask 1041408   ;;  %vm297_vm2 = vsmask.f32 1280  ;;  %vm299_vm3 = vcmask 1043458  }
 0x11a   :  { %vm300_vm4 = vsmask.f32 3328  ;;  %vm298_vm5 = vmand %vm291_vm1, %vm297_vm2  ;;  %v303_v41 = vld [vmem:[#allocation7] sm:$0xf] }
 0x11b   :  { %283 = vst [vmem:[#allocation1] ss:$2 sm:$0xff] %v281_v36  ;;  %vm301_vm6 = vmand %vm299_vm3, %vm300_vm4 }
 0x11c   :  { %vm302_vm7 = vmor %vm301_vm6, %vm298_vm5 }
 0x122   :  { %v284_v37 = vld.sshfl [vmem:[#allocation1] sm:$0xff pattern:$0x75316420]  ;;  %v285_v38 = vld.sshfl [vmem:[#allocation1 + $0x8] sm:$0xff pattern:$0x75316420] }
 0x123   :  { %v288_v39 = vpack.c.bf16 %v285_v38, %v284_v37 }
 0x125   :  { %v290_v40 = vrot.slane %v288_v39, 2 }
 0x127   :  { %v294_v42 = vsel %vm291_vm1, %v288_v39, %v290_v40 }
 0x128   :  { %v304_v43 = vsel %vm302_vm7, %v294_v42, %v303_v41 }
 0x129   :  { %305 = vst [vmem:[#allocation7] sm:$0xf] %v304_v43 }
 0x12a PF:  { %p495_p7 = scmp.ne.s32.totalorder %s749_s0, 7 }
 0x12b   :  { %s657_s30 = sld [smem:[#allocation4]] (!%p495_p7) }
 0x12c   :  { %309 = sbr.rel (%p495_p7) target bundleno = 407 (0x197), region = 53  ;;  %s659_s5 = sld [smem:[#allocation4 + $0x1]] (!%p495_p7) }
 0x12d   :  { %s661_s6 = sld [smem:[#allocation4 + $0x8]] (!%p495_p7) }
 0x12e   :  { %s663_s7 = sld [smem:[#allocation4 + $0x9]] (!%p495_p7) }
 0x12f   :  { %s665_s0 = sld [smem:[#allocation4 + $0x10]] (!%p495_p7) }
 0x130   :  { %s667_s8 = sld [smem:[#allocation4 + $0x11]] (!%p495_p7) }
 0x131   :  { %vm354_vm4 = vcmask 1040384   ;;  %vm355_vm5 = vsmask.f32 256  ;;  %vm357_vm6 = vcmask 1042434   ;;  %vm358_vm7 = vsmask.f32 2304 }
 0x132   :  { %p312_p8 = scmp.eq.f32.partialorder %s659_s5, %s657_s30  ;;  %s313_s9 = ssub.f32 %s659_s5, %s657_s30  ;;  %v361_v41 = vld [vmem:[#allocation7] sm:$0x5] }
 0x134   :  { %s763_s9 = smov (%p312_p8, %s313_s9), 1.0  ;;  %p366_p9 = scmp.eq.f32.partialorder %s663_s7, %s661_s6 }
 0x135   :  { %s367_s10 = ssub.f32 %s663_s7, %s661_s6  ;;  %v315_v44 = vstv %s763_s9 }
 0x136   :  { %p417_p10 = scmp.eq.f32.partialorder %s667_s8, %s665_s0  ;;  %s418_s11 = ssub.f32 %s667_s8, %s665_s0  ;;  %516 = vrcp.f32 %v315_v44  ;;  %v327_v49 = vand.u32 2147483648, %v315_v44  ;;  %vm321_vm8 = vweird.f32 %v315_v44  ;;  %v325_v52 = vand.u32 2147483647, %v315_v44 }
 0x137   :  { %s765_s10 = smov (%p366_p9, %s367_s10), 1.0 }
 0x138   :  { %s767_s11 = smov (%p417_p10, %s418_s11), 1.0  ;;  %v369_v45 = vstv %s765_s10  ;;  %v328_v56 = vor.u32 1.1754944e-38, %v327_v49  ;;  %vm326_vm13 = vcmp.eq.f32.partialorder %v325_v52, 8.507059e+37  ;;  %v465_v52 = vld [vmem:[#allocation7] sm:$0xa] }
 0x139   :  { %518 = vrcp.f32 %v369_v45  ;;  %v420_v46 = vstv %s767_s11  ;;  %vm375_vm10 = vweird.f32 %v369_v45  ;;  %v381_v57 = vand.u32 2147483648, %v369_v45  ;;  %s333_s12 = scalar_select %p312_p8, 0.0, %s657_s30 }
 0x13a   :  { %520 = vrcp.f32 %v420_v46  ;;  %v379_v60 = vand.u32 2147483647, %v369_v45  ;;  %vm426_vm14 = vweird.f32 %v420_v46  ;;  %v432_v63 = vand.u32 2147483648, %v420_v46  ;;  %s387_s13 = scalar_select %p366_p9, 0.0, %s661_s6 }
 0x13b   :  { %v430_v3 = vand.u32 2147483647, %v420_v46  ;;  %v382_v5 = vor.u32 1.1754944e-38, %v381_v57  ;;  %v334_v15 = vstv %s333_s12  ;;  %s438_s14 = scalar_select %p417_p10, 0.0, %s665_s0 }
 0x13c   :  { %v517_v47 = vpop.eup %516  ;;  %vm380_vm1 = vcmp.eq.f32.partialorder %v379_v60, 8.507059e+37  ;;  %v433_v9 = vor.u32 1.1754944e-38, %v432_v63  ;;  %v335_v16 = vsub.f32 %v596_v1, %v334_v15  ;;  %v388_v17 = vstv %s387_s13 }
 0x13d   :  { %v317_v48 = vmul.f32 %v517_v47, %v315_v44  ;;  %vm322_vm9 = vweird.f32 %v517_v47  ;;  %vm431_vm3 = vcmp.eq.f32.partialorder %v430_v3, 8.507059e+37  ;;  %v439_v18 = vstv %s438_s14 }
 0x13e   :  { %vm690_vm11 = vmor %vm321_vm8, %vm322_vm9  ;;  %v389_v21 = vsub.f32 %v596_v1, %v388_v17  ;;  %v440_v22 = vsub.f32 %v596_v1, %v439_v18 }
 0x13f   :  { %v519_v50 = vpop.eup %518  ;;  %v318_v51 = vsub.f32 1.0, %v317_v48  ;;  %vm722_vm8 = vmand %vm354_vm4, %vm355_vm5 }
 0x140   :  { %v371_v53 = vmul.f32 %v519_v50, %v369_v45  ;;  %v521_v54 = vpop.eup %520  ;;  %vm376_vm12 = vweird.f32 %v519_v50  ;;  %vm727_vm9 = vmand %vm357_vm6, %vm358_vm7 }
 0x141   :  { %v319_v55 = vmul.f32 %v517_v47, %v318_v51  ;;  %v422_v61 = vmul.f32 %v521_v54, %v420_v46  ;;  %vm427_vm15 = vweird.f32 %v521_v54  ;;  %vm377_vm0 = vmor %vm375_vm10, %vm376_vm12  ;;  %vm458_vm10 = vcmask 1041409  }
 0x142   :  { %v372_v59 = vsub.f32 1.0, %v371_v53  ;;  %vm428_vm2 = vmor %vm426_vm14, %vm427_vm15  ;;  %vm349_vm12 = vcmask 1041408   ;;  %vm462_vm14 = vsmask.f32 3328 }
 0x143   :  { %v320_v62 = vadd.f32 %v517_v47, %v319_v55  ;;  %v423_v2 = vsub.f32 1.0, %v422_v61  ;;  %vm360_vm15 = vmor %vm727_vm9, %vm722_vm8 }
 0x144   :  { %v373_v0 = vmul.f32 %v519_v50, %v372_v59 }
 0x145   :  { %v324_v4 = vsel %vm690_vm11, %v517_v47, %v320_v62  ;;  %v424_v8 = vmul.f32 %v521_v54, %v423_v2  ;;  %vm459_vm11 = vsmask.f32 1280 }
 0x146   :  { %v329_v6 = vsel %vm326_vm13, %v328_v56, %v324_v4  ;;  %v374_v7 = vadd.f32 %v519_v50, %v373_v0  ;;  %vm461_vm13 = vcmask 1043459  }
 0x147   :  { %503 = vpush %v329_v6  ;;  %v425_v11 = vadd.f32 %v521_v54, %v424_v8 }
 0x148   :  { %v378_v10 = vsel %vm377_vm0, %v519_v50, %v374_v7  ;;  %vm407_vm0 = vsmask.f32 7938 }
 0x149   :  { %v383_v12 = vsel %vm380_vm1, %v382_v5, %v378_v10  ;;  %v429_v13 = vsel %vm428_vm2, %v521_v54, %v425_v11  ;;  %vm735_vm1 = vmand %vm458_vm10, %vm459_vm11 }
 0x14a   :  { %505 = vpush %v383_v12  ;;  %v434_v14 = vsel %vm431_vm3, %v433_v9, %v429_v13  ;;  %vm463_vm2 = vmand %vm461_vm13, %vm462_vm14  ;;  %vm409_vm3 = vsmask.f32 7946 }
 0x14b   :  { %507 = vpush %v434_v14  ;;  %vm408_vm5 = vmand %vm354_vm4, %vm407_vm0 }
 0x14c   :  { %vm464_vm7 = vmor %vm463_vm2, %vm735_vm1 }
 0x14d   :  { %vm410_vm8 = vmand %vm357_vm6, %vm409_vm3 }
 0x14e   :  { %vm411_vm9 = vmor %vm410_vm8, %vm408_vm5 }
 0x178   :  { %s504_s15 = spop %503 }
 0x179   :  { %s331_s16 = smul.f32 255.0, %s504_s15 }
 0x17b   :  { %s769_s16 = smov (%p312_p8, %s331_s16), 1.0  ;;  %s506_s17 = spop %505 }
 0x17c   :  { %v336_v19 = vstv %s769_s16  ;;  %s385_s18 = smul.f32 255.0, %s506_s17  ;;  %s508_s19 = spop %507 }
 0x17d   :  { %v337_v20 = vmul.f32 %v336_v19, %v335_v16  ;;  %s436_s20 = smul.f32 255.0, %s508_s19 }
 0x17e   :  { %s771_s18 = smov (%p366_p9, %s385_s18), 1.0 }
 0x17f   :  { %v338_v23 = vmax.f32 %v337_v20, 0.0  ;;  %s773_s20 = smov (%p417_p10, %s436_s20), 1.0  ;;  %v390_v24 = vstv %s771_s18 }
 0x180   :  { %v391_v26 = vmul.f32 %v390_v24, %v389_v21  ;;  %v441_v27 = vstv %s773_s20 }
 0x181   :  { %v339_v25 = vmin.f32 %v338_v23, 255.0  ;;  %v442_v28 = vmul.f32 %v441_v27, %v440_v22 }
 0x182   :  { %v392_v30 = vmax.f32 %v391_v26, 0.0 }
 0x183   :  { %v340_v29 = vfloor.f32 %v339_v25  ;;  %v443_v31 = vmax.f32 %v442_v28, 0.0 }
 0x184   :  { %v393_v34 = vmin.f32 %v392_v30, 255.0 }
 0x185   :  { %v342_v32 = vperm.slane %v340_v29, 0  ;;  %v343_v33 = vperm.slane %v340_v29, 4  ;;  %v444_v36 = vmin.f32 %v443_v31, 255.0 }
 0x186   :  { %v394_v38 = vfloor.f32 %v393_v34 }
 0x187   :  { %v346_v37 = vpack.c.bf16 %v343_v33, %v342_v32  ;;  %v445_v39 = vfloor.f32 %v444_v36 }
 0x188   :  { %v396_v42 = vperm.slane %v394_v38, 1  ;;  %v397_v43 = vperm.slane %v394_v38, 5 }
 0x189   :  { %v348_v40 = vrot.slane %v346_v37, 2  ;;  %v447_v44 = vperm.slane %v445_v39, 2  ;;  %v448_v45 = vperm.slane %v445_v39, 6 }
 0x18a   :  { %v400_v49 = vpack.c.bf16 %v397_v43, %v396_v42 }
 0x18b   :  { %v352_v47 = vsel %vm349_vm12, %v346_v37, %v348_v40  ;;  %v451_v50 = vpack.c.bf16 %v448_v45, %v447_v44 }
 0x18c   :  { %v362_v48 = vsel %vm360_vm15, %v352_v47, %v361_v41  ;;  %v402_v53 = vrot.slane %v400_v49, 2 }
 0x18d   :  { %363 = vst [vmem:[#allocation7] sm:$0x5] %v362_v48  ;;  %v453_v51 = vrot.slane %v451_v50, 2 }
 0x18e   :  { %v405_v56 = vsel %vm349_vm12, %v400_v49, %v402_v53 }
 0x18f   :  { %v456_v54 = vsel %vm349_vm12, %v451_v50, %v453_v51 }
 0x190   :  { %v466_v55 = vsel %vm464_vm7, %v456_v54, %v465_v52 }
 0x191   :  { %467 = vst [vmem:[#allocation7] sm:$0xa] %v466_v55 }
 0x194   :  { %v412_v57 = vld [vmem:[#allocation7] sm:$0x5] }
 0x195   :  { %v413_v58 = vsel %vm411_vm9, %v405_v56, %v412_v57 }
 0x196   :  { %414 = vst [vmem:[#allocation7] sm:$0x5] %v413_v58 }
 0x197 PF:  { %s475_s2 = sshll.u32 %s753_s4, 4  ;;  %s564_s3 = smov [#allocation7]   ;;  %s476_s2 = int_to_ptr.hbm [resolvable:$true] %s475_s2 }
 0x198   :  { %s473_s23 = sshll.u32 %s564_s3, 4  ;;  %s474_s23 = int_to_ptr.vmem [resolvable:$true] %s473_s23 }
 0x199   :  { %478 = dma.vmem_to_hbm [thread:$0]  %s474_s23, 64, %s476_s2, [#allocation5]  }
 0x19a   :  { %560 = dma.done.wait [#allocation5], 64  }
 0x19b   :  { %561 = vsyncadd [#allocation5], 4294967232 }
 0x19c   :  { %483 = vsyncpa [#allocation5], 1 }
 0x19d   :  { %484 = vsyncpa [#allocation6], 1 }

</bundles_post_ra>
